<compile_context>
chip_gen: v7x
topology: tpu7x:2x2x1
jax: 0.10.0
libtpu: 0.0.40
codegen_flags: <defaults>
</compile_context>

<pallas_src>
import numpy as np
import jax
import jax.numpy as jnp
from jax import lax
from jax.experimental import pallas as pl
from jax.experimental.pallas import tpu as pltpu


# ---------------------------------------------------------------------------
# Parameter / cache precomputation (mirrors RoPEFrequencyCache)
# ---------------------------------------------------------------------------
def rope_frequency_cache(d_model: int, max_seq_len: int, base: float):
    d = d_model // 2
    j = jnp.arange(d, dtype=jnp.float32)
    theta = 1.0 / (base ** (2.0 * j / d_model))            # (d,)
    m = jnp.arange(max_seq_len, dtype=jnp.float32)          # (max_seq_len,)
    angles = m[:, None] * theta[None, :]                    # (max_seq_len, d)
    return jnp.cos(angles), jnp.sin(angles)


# ---------------------------------------------------------------------------
# Pallas kernel: one (tB, tS, L) slab of x, L = heads*D flattened into lanes.
#   out[2j]   = x[2j]   * cos[j] - x[2j+1] * sin[j]
#   out[2j+1] = x[2j+1] * cos[j] + x[2j]   * sin[j]
# Implemented with two XLU lane rolls, one signed sin stream and an even-lane
# select:
#   out = x*cos + where(even_lane, x_next, x_prev) * sin_signed
# where sin_signed = -sin on even lanes, +sin on odd lanes. Roll wrap-around
# lanes are never selected (even lanes take x_next, last even lane is L-2;
# odd lanes take x_prev, first odd lane is 1), and pairs never straddle a head
# boundary because D is even.
# ---------------------------------------------------------------------------
def rope_kernel(x_ref, cos_ref, sin_ref, o_ref):
    x = x_ref[...].astype(jnp.float32)                      # (tB, tS, L)
    L = x.shape[-1]
    x_next = pltpu.roll(x, shift=L - 1, axis=2)             # [i] = x[i+1]
    x_prev = pltpu.roll(x, shift=1, axis=2)                 # [i] = x[i-1]
    lane = lax.broadcasted_iota(jnp.int32, x.shape, dimension=2)
    partner = jnp.where((lane & 1) == 0, x_next, x_prev)
    cos = cos_ref[...].astype(jnp.float32)[None]            # (1, tS, L)
    sin = sin_ref[...].astype(jnp.float32)[None]            # signed sin
    o_ref[...] = (x * cos + partner * sin).astype(o_ref.dtype)


# ---------------------------------------------------------------------------
# Tiling helpers
# ---------------------------------------------------------------------------
def _sublane_pack(itemsize: int) -> int:
    # Sub-32-bit dtypes pack along sublanes: f32 -> 8, bf16 -> 16, int8/fp8 -> 32.
    return max(8, 32 // max(1, itemsize))


def _choose_tiles(B: int, S: int, L: int, itemsize: int, target_bytes: int = 2 << 20):
    """Pick (tB, tS) so one x tile is ~target_bytes, sublane-aligned, and the
    grid keeps >= 2 steps (v7x has 2 TensorCores)."""
    pack = _sublane_pack(itemsize)
    bytes_per_row = max(1, L * itemsize)
    rows = max(1, target_bytes // bytes_per_row)            # (b, s) rows per tile
    if rows >= B * S:
        tB, tS = B, S
    elif rows >= S:
        tS = S
        tB = max(1, min(B, rows // S))
    else:
        tB = 1
        tS = min(S, max(pack, (rows // pack) * pack))
    # Keep >= 2 grid steps alive so v7x's second TensorCore gets work.
    if pl.cdiv(S, tS) * pl.cdiv(B, tB) < 2:
        if tB > 1:
            tB = pl.cdiv(tB, 2)
        elif tS >= 2 * pack:
            tS = max(pack, ((tS // 2) // pack) * pack)
    return tB, tS


def _vmem_limit_bytes() -> int:
    default = 48 * 1024 * 1024          # safe on v7x (64 MiB physical per TC)
    try:
        cap = int(pltpu.get_tpu_info().vmem_capacity_bytes)
    except Exception:
        return default
    # Up to 96 MiB on v5e/v6e (128 MiB physical); stays at 48 MiB on v7x.
    return max(default, min(96 * 1024 * 1024, (cap * 3) // 4))


# ---------------------------------------------------------------------------
# Module equivalent
# ---------------------------------------------------------------------------
class RoPEPallas:
    """Pallas-TPU equivalent of the PyTorch RoPE module."""

    def __init__(self, d_model: int, max_seq_len: int, base: float):
        if d_model % 2 != 0:
            raise ValueError(f"Embedding dimension {d_model} must be even for RoPE.")
        self.d_model = d_model
        self.max_seq_len = max_seq_len
        self.base = base
        # Base cache, identical to RoPEFrequencyCache: (max_seq_len, d_model // 2).
        self.cos_cached, self.sin_cached = rope_frequency_cache(d_model, max_seq_len, base)
        # Expanded interleaved streams (max_seq_len, d_model), built once:
        #   cos_i[:, 2j] = cos_i[:, 2j+1] = cos[:, j]
        #   sin_signed_i[:, 2j] = -sin[:, j] ; sin_signed_i[:, 2j+1] = +sin[:, j]
        cos_full = jnp.repeat(self.cos_cached, 2, axis=-1)
        sin_full = jnp.repeat(self.sin_cached, 2, axis=-1)
        is_even = (jnp.arange(d_model) % 2) == 0
        self._cos_i = cos_full
        self._sin_signed_i = jnp.where(is_even, -sin_full, sin_full)
        # Head-tiled, dtype-matched streams, built once per (num_heads, dtype).
        self._stream_cache = {}

    def _streams(self, num_heads: int, dtype):
        key = (num_heads, jnp.dtype(dtype).name)
        if key not in self._stream_cache:
            cos_l = jnp.tile(self._cos_i, (1, num_heads)).astype(dtype)
            sin_l = jnp.tile(self._sin_signed_i, (1, num_heads)).astype(dtype)
            self._stream_cache[key] = (cos_l, sin_l)
        return self._stream_cache[key]

    def __call__(self, x, offset: int = 0):
        # TODO(synk): a traced/dynamic offset (decode path) would need scalar
        # prefetch or lax.dynamic_slice; here offset is a static Python int.
        orig_shape = x.shape
        B, S, D = x.shape[0], x.shape[1], x.shape[-1]
        if D != self.d_model:
            raise ValueError(f"Last dim {D} must equal d_model {self.d_model}.")
        if not (0 <= offset and offset + S <= self.max_seq_len):
            raise ValueError("positions out of bounds for max_seq_len")
        inter = x.shape[2:-1]
        H = int(np.prod(inter)) if inter else 1
        L = H * D
        assert L % 2 == 0  # pairs never straddle the roll wrap-around (D even)
        # Note: L % 128 == 0 gives unmasked lane-dense stores (fastest path);
        # other L still run correctly via masked partial stores, just slower.

        const_dtype = x.dtype if jnp.issubdtype(x.dtype, jnp.floating) else jnp.float32
        cos_l, sin_l = self._streams(H, const_dtype)
        cos_s = cos_l[offset:offset + S]          # (S, L) — tiny vs. B*S*L of x
        sin_s = sin_l[offset:offset + S]

        x3 = x.reshape(B, S, L)                   # free: trailing dims contiguous
        tB, tS = _choose_tiles(B, S, L, x.dtype.itemsize)
        n_s, n_b = pl.cdiv(S, tS), pl.cdiv(B, tB)

        # Grid: seq-tiles outer, batch inner -> the cos/sin block index is
        # unchanged across consecutive b steps, so Pallas skips re-fetching it.
        # Padded tail blocks (S % tS or B % tB != 0) read undefined rows, but
        # rolls are lane-only and out-of-bounds writes are masked -> correct.
        out = pl.pallas_call(
            rope_kernel,
            out_shape=jax.ShapeDtypeStruct((B, S, L), x.dtype),
            grid=(n_s, n_b),
            in_specs=[
                pl.BlockSpec((tB, tS, L), lambda s, b: (b, s, 0)),
                pl.BlockSpec((tS, L), lambda s, b: (s, 0)),
                pl.BlockSpec((tS, L), lambda s, b: (s, 0)),
            ],
            out_specs=pl.BlockSpec((tB, tS, L), lambda s, b: (b, s, 0)),
            compiler_params=pltpu.CompilerParams(
                dimension_semantics=("parallel", "parallel"),
                vmem_limit_bytes=_vmem_limit_bytes(),
            ),
        )(x3, cos_s, sin_s)

        return out.reshape(orig_shape)


# ---------------------------------------------------------------------------
# Pure-JAX reference (mirrors RoPE.apply_rope) for correctness checks.
# ---------------------------------------------------------------------------
def rope_reference(x, cos, sin):
    # x: (B, S, H, D), cos/sin: (S, D/2)
    c = cos[None, :, None, :]
    s = sin[None, :, None, :]
    x_even = x[..., 0::2]
    x_odd = x[..., 1::2]
    re = x_even * c - x_odd * s
    ro = x_even * s + x_odd * c
    return jnp.stack([re, ro], axis=-1).reshape(x.shape)


if __name__ == "__main__":
    # Module config: d_model=32, max_seq_len=16, base=10000.0
    d_model, max_seq_len, base = 32, 16, 10000.0
    B, S, H = 2, 8, 4  # x: (Batch, SeqLen, Heads, Dim) -> lane width H*D = 128

    rope = RoPEPallas(d_model, max_seq_len, base)

    key = jax.random.PRNGKey(0)
    x = jax.random.normal(key, (B, S, H, d_model), dtype=jnp.float32)

    # f32, offset=0 (exact check: f32 constants, f32 compute).
    out = jax.block_until_ready(rope(x, offset=0))
    ref = rope_reference(x, rope.cos_cached[:S], rope.sin_cached[:S])
    np.testing.assert_allclose(np.asarray(out), np.asarray(ref), rtol=1e-5, atol=1e-5)

    # f32, non-zero offset (decode-style absolute positions).
    off = 5
    out_off = jax.block_until_ready(rope(x, offset=off))
    ref_off = rope_reference(x, rope.cos_cached[off:off + S], rope.sin_cached[off:off + S])
    np.testing.assert_allclose(np.asarray(out_off), np.asarray(ref_off), rtol=1e-5, atol=1e-5)

    # bf16 activations use bf16 (dtype-matched) constants; looser tolerance.
    x_bf16 = x.astype(jnp.bfloat16)
    out_bf16 = jax.block_until_ready(rope(x_bf16, offset=0))
    ref_bf16 = rope_reference(x_bf16.astype(jnp.float32),
                              rope.cos_cached[:S], rope.sin_cached[:S])
    np.testing.assert_allclose(np.asarray(out_bf16.astype(jnp.float32)),
                               np.asarray(ref_bf16), rtol=3e-2, atol=3e-2)

    print("KERNEL_OK")
</pallas_src>

<mosaic_0001>
module attributes {stable_mosaic.version = 11 : i64} {
  func.func @rope_kernel(%arg0: i32, %arg1: i32, %arg2: memref<1x8x128xf32, #tpu.memory_space<vmem>>, %arg3: memref<8x128xf32, #tpu.memory_space<vmem>>, %arg4: memref<8x128xf32, #tpu.memory_space<vmem>>, %arg5: memref<1x8x128xf32, #tpu.memory_space<vmem>>) attributes {dimension_semantics = [#tpu.dimension_semantics<parallel>, #tpu.dimension_semantics<parallel>], iteration_bounds = array<i64: 1, 2>, scalar_prefetch = 0 : i64, scratch_operands = 0 : i64, tpu.core_type = #tpu.core_type<tc>, window_params = [{transform_indices = @transform_0, window_bounds = array<i64: 1, 8, 128>}, {transform_indices = @transform_1, window_bounds = array<i64: 8, 128>}, {transform_indices = @transform_2, window_bounds = array<i64: 8, 128>}, {transform_indices = @transform_3, window_bounds = array<i64: 1, 8, 128>}]} {
    %c0 = arith.constant 0 : index
    %c0_0 = arith.constant 0 : index
    %c0_1 = arith.constant 0 : index
    %0 = vector.load %arg2[%c0, %c0_0, %c0_1] : memref<1x8x128xf32, #tpu.memory_space<vmem>>, vector<1x8x128xf32>
    %c127_i32 = arith.constant 127 : i32
    %1 = tpu.dynamic_rotate %0 by %c127_i32 dim 2 : vector<1x8x128xf32>, i32 -> vector<1x8x128xf32>
    %c1_i32 = arith.constant 1 : i32
    %2 = tpu.dynamic_rotate %0 by %c1_i32 dim 2 : vector<1x8x128xf32>, i32 -> vector<1x8x128xf32>
    %3 = tpu.iota {dimensions = array<i32: 2>} : vector<1x8x128xi32>
    %c1_i32_2 = arith.constant 1 : i32
    %4 = vector.broadcast %c1_i32_2 : i32 to vector<1x8x128xi32>
    %5 = arith.andi %3, %4 : vector<1x8x128xi32>
    %c0_i32 = arith.constant 0 : i32
    %6 = vector.broadcast %c0_i32 : i32 to vector<1x8x128xi32>
    %7 = arith.cmpi eq, %5, %6 : vector<1x8x128xi32>
    %8 = arith.select %7, %1, %2 : vector<1x8x128xi1>, vector<1x8x128xf32>
    %c0_3 = arith.constant 0 : index
    %c0_4 = arith.constant 0 : index
    %9 = vector.load %arg3[%c0_3, %c0_4] : memref<8x128xf32, #tpu.memory_space<vmem>>, vector<8x128xf32>
    %10 = vector.shape_cast %9 : vector<8x128xf32> to vector<1x8x128xf32>
    %c0_5 = arith.constant 0 : index
    %c0_6 = arith.constant 0 : index
    %11 = vector.load %arg4[%c0_5, %c0_6] : memref<8x128xf32, #tpu.memory_space<vmem>>, vector<8x128xf32>
    %12 = vector.shape_cast %11 : vector<8x128xf32> to vector<1x8x128xf32>
    %13 = arith.mulf %0, %10 : vector<1x8x128xf32>
    %14 = arith.mulf %8, %12 : vector<1x8x128xf32>
    %15 = arith.addf %13, %14 : vector<1x8x128xf32>
    %c0_7 = arith.constant 0 : index
    %c0_8 = arith.constant 0 : index
    %c0_9 = arith.constant 0 : index
    %16 = vector.load %arg5[%c0_7, %c0_8, %c0_9] : memref<1x8x128xf32, #tpu.memory_space<vmem>>, vector<1x8x128xf32>
    tpu.vector_store %arg5[%c0_7, %c0_8, %c0_9], %15 {strides = array<i32>} : memref<1x8x128xf32, #tpu.memory_space<vmem>>, vector<1x8x128xf32>,
    return
  }
  func.func @transform_0(%arg0: i32, %arg1: i32) -> (i32, i32, i32) {
    %c0_i32 = arith.constant 0 : i32
    %c0_i32_0 = arith.constant 0 : i32
    return %arg1, %arg0, %c0_i32 : i32, i32, i32
  }
  func.func @transform_1(%arg0: i32, %arg1: i32) -> (i32, i32) {
    %c0_i32 = arith.constant 0 : i32
    %c0_i32_0 = arith.constant 0 : i32
    return %arg0, %c0_i32 : i32, i32
  }
  func.func @transform_2(%arg0: i32, %arg1: i32) -> (i32, i32) {
    %c0_i32 = arith.constant 0 : i32
    %c0_i32_0 = arith.constant 0 : i32
    return %arg0, %c0_i32 : i32, i32
  }
  func.func @transform_3(%arg0: i32, %arg1: i32) -> (i32, i32, i32) {
    %c0_i32 = arith.constant 0 : i32
    %c0_i32_0 = arith.constant 0 : i32
    return %arg1, %arg0, %c0_i32 : i32, i32, i32
  }
}

</mosaic_0001>

<bundles_post_ra>
// kernel: tpu_custom_call.1
= control target key start
LH: loop header
LB: loop body
LE: loop exit
PB: predicated region body
PF: predicated region fallthrough
CT: control target
= control target key end

     0   :  { %8 = vsyncpa [#allocation3], 0  ;;  %s921_s0 = inlined_call_operand.hbm [shape: f32[2,8,128], index: 0, kind: input, shape index: {}]   ;;  %s922_s1 = inlined_call_operand.hbm [shape: f32[8,128], index: 1, kind: input, shape index: {}]   ;;  %s923_s2 = inlined_call_operand.hbm [shape: f32[8,128], index: 2, kind: input, shape index: {}]   ;;  %s924_s3 = inlined_call_operand.hbm [shape: f32[2,8,128], index: 3, kind: output, shape index: {}]  }
   0x1   :  { %10 = vsyncpa [#allocation3 + $0x1], 0 }
   0x2   :  { %11 = vsyncpa [#allocation6], 0 }
   0x3   :  { %12 = vsyncpa [#allocation4], 0 }
   0x4   :  { %14 = vsyncpa [#allocation4 + $0x1], 0  ;;  %s678_s12 = smov 0   ;;  %s680_s13 = smov 0  }
   0x5   :  { %s682_s14 = smov 0   ;;  %s684_s15 = smov 0  }
   0x6   :  { %s686_s16 = smov 0   ;;  %s688_s17 = smov 0  }
   0x7 LB: > { %s376_s18 = sadd.s32 4294967295, %s650_s17   ;;  %s377_s19 = sadd.s32 4294967294, %s650_s17   ;;  %s650_s17 = sphi %s688_s17, %s20_s17   ;;  %s646_s16 = sphi %s686_s16, %s947_s16   ;;  %s642_s15 = sphi %s684_s15, %s946_s15   ;;  %s638_s14 = sphi %s682_s14, %s945_s14   ;;  %s634_s13 = sphi %s680_s13, %s944_s13   ;;  %s630_s12 = sphi %s678_s12, %s943_s12  }
   0x8   : > { %p54_p0 = scmp.ne.s32.totalorder %s634_s13, %s630_s12  ;;  %p712_p1 = scmp.eq.s32.totalorder %s376_s18, 0 }
   0x9   : > { %p716_p2 = scmp.eq.s32.totalorder %s376_s18, 1  ;;  %p138_p3 = scmp.eq.s32.totalorder %s377_s19, 1 }
   0xa   : > { %s929_s20 = scalar_select %p712_p1, 1, 0 }
   0xb   : > { %s930_s21 = scalar_select %p716_p2, 1, 0 }
   0xc   : > { %p722_p4 = por %p712_p1, %p54_p0  ;;  %p378_p5 = scmp.ge.s32.totalorder %s650_s17, 1 }
   0xd   : > { %p727_p6 = por %p138_p3, %p54_p0  ;;  %p145_p7 = scmp.lt.s32.totalorder %s650_s17, 3 }
   0xe   : > { %s931_s22 = scalar_select %p722_p4, 1, 0 }
   0xf   : > { %s932_s23 = scalar_select %p727_p6, 1, 0 }
  0x10   : > { %p732_p8 = pnand %p378_p5, %p145_p7  ;;  %s652_s25 = smov [#allocation5]  }
  0x11   : > { %s160_s26 = sshll.u32 %s652_s25, 4  ;;  %s653_s27 = smov [#allocation7]   ;;  %s161_s26 = int_to_ptr.vmem [resolvable:$true] %s160_s26 }
  0x12   : > { %s933_s24 = scalar_select %p732_p8, 1, 0 }
  0x13   : > { %p405_p10 = pneg %p732_p8  ;;  %s173_s28 = sshll.u32 %s653_s27, 4  ;;  %s745_s28 = int_to_ptr.vmem [resolvable:$true] %s173_s28 }
  0x14   : > { %s478_s5 = scalar_lea.hbm %s922_s1, 128 }
  0x15   : > { %p741_p11 = pnand %p405_p10, %p712_p1  ;;  %p479_p12 = scmp.ne.s32.totalorder %s922_s1, %s478_s5 }
  0x16   : > { %p485_p5 = scmp.lt.u32.totalorder %s478_s5, %s922_s1 }
  0x17   : > { %p480_p13 = pneg %p741_p11 }
  0x19   : > { %p481_p0 = pnand %p480_p13, %p479_p12 }
  0x1b   : > { %p482_p3 = pneg %p481_p0 }
  0x1d   : > { %p487_p7 = pnand %p485_p5, %p482_p3 }
  0x1f   : > { %490 = shalt.err (!%p487_p7)
}
  0x20   : > { %s491_s10 = scalar_lea.vmem %s161_s26, 128  ;;  %p499_p1 = scmp.lt.s32.totalorder %s161_s26, %s161_s26 }
  0x21   : > { %p492_p10 = scmp.ne.s32.totalorder %s161_s26, %s491_s10  ;;  %p500_p4 = scmp.lt.s32.totalorder %s491_s10, %s491_s10 }
  0x23   : > { %p494_p9 = pnand %p492_p10, %p480_p13  ;;  %p501_p8 = por %p500_p4, %p499_p1 }
  0x25   : > { %p495_p6 = pneg %p494_p9 }
  0x27   : > { %p502_p2 = pnand %p501_p8, %p495_p6 }
  0x29   : > { %505 = shalt.err (!%p502_p2)
}
  0x2a   : > { %408 = dma.hbm_to_vmem [thread:$0]  (!%p741_p11), %s922_s1, 128, %s161_s26, [#allocation6]  }
  0x2b   : > { %s506_s27 = scalar_lea.hbm %s923_s2, 128 }
  0x2c   : > { %p507_p9 = scmp.ne.s32.totalorder %s923_s2, %s506_s27  ;;  %p513_p2 = scmp.lt.u32.totalorder %s506_s27, %s923_s2 }
  0x2e   : > { %p509_p1 = pnand %p507_p9, %p480_p13 }
  0x30   : > { %p510_p4 = pneg %p509_p1 }
  0x32   : > { %p515_p6 = pnand %p513_p2, %p510_p4 }
  0x34   : > { %518 = shalt.err (!%p515_p6)
}
  0x35   : > { %s519_s26 = scalar_lea.vmem %s745_s28, 128  ;;  %p527_p3 = scmp.lt.s32.totalorder %s745_s28, %s745_s28 }
  0x36   : > { %p520_p8 = scmp.ne.s32.totalorder %s745_s28, %s519_s26  ;;  %p528_p5 = scmp.lt.s32.totalorder %s519_s26, %s519_s26 }
  0x38   : > { %p522_p12 = pnand %p520_p8, %p480_p13  ;;  %p529_p7 = por %p528_p5, %p527_p3 }
  0x3a   : > { %p523_p0 = pneg %p522_p12 }
  0x3c   : > { %p530_p10 = pnand %p529_p7, %p523_p0 }
  0x3e   : > { %533 = shalt.err (!%p530_p10)
}
  0x3f   : > { %411 = dma.hbm_to_vmem [thread:$0]  (!%p741_p11), %s923_s2, 128, %s745_s28, [#allocation6]  }
  0x40   : > { %s29_s9 = sadd.s32 1, %s646_s16  ;;  %s41_s10 = sadd.s32 1, %s638_s14 }
  0x41   : > { %p30_p13 = scmp.ge.s32.totalorder %s29_s9, 2  ;;  %p48_p9 = scmp.ne.s32.totalorder %s638_s14, %s634_s13 }
  0x42   : > { %p49_p1 = scmp.eq.s32.totalorder %s650_s17, 0  ;;  %p422_p4 = scmp.lt.s32.totalorder %s650_s17, 2 }
  0x43   : > { %s949_s9 = smov (%p30_p13, %s29_s9), 0  ;;  %p935_p6 = scmp.ne.s32.totalorder %s930_s21, 0 }
  0x44   : > { %p50_p2 = por %p49_p1, %p48_p9  ;;  %s36_s11 = ssub.s32 %s646_s16, %s949_s9 }
  0x45   : > { %p804_p8 = por %p935_p6, %p48_p9  ;;  %s184_s18 = sand.u32 1, %s638_s14  }
  0x46   : > { %p39_p12 = scmp.eq.s32.totalorder %s36_s11, 0  ;;  %s382_s28 = sshll.u32 %s184_s18, 3 }
  0x47   : > { %s383_s19 = sshll.u32 %s646_s16, 7  ;;  %s188_s21 = scalar_lea.vmem [#allocation2], %s382_s28 }
  0x48   : > { %s813_s25 = scalar_select %p39_p12, %s638_s14, %s41_s10  }
  0x49   : > { %s818_s4 = scalar_lea.hbm %s921_s0, %s383_s19  ;;  %s196_s5 = sshll.u32 %s188_s21, 4  ;;  %s826_s5 = int_to_ptr.vmem [resolvable:$true] %s196_s5 }
  0x4a   : > { %p822_p11 = pnand %p422_p4, %p50_p2  ;;  %s185_s26 = scalar_lea.sflag [#allocation3], %s184_s18 }
  0x4b   : > { %s534_s7 = scalar_lea.hbm %s818_s4, 128  ;;  %s539_s11 = scalar_lea.hbm %s921_s0, 256 }
  0x4c   : > { %p535_p0 = scmp.ne.s32.totalorder %s818_s4, %s534_s7  ;;  %p536_p3 = pneg %p822_p11 }
  0x4d   : > { %p540_p10 = scmp.lt.u32.totalorder %s818_s4, %s921_s0  ;;  %p541_p13 = scmp.lt.u32.totalorder %s539_s11, %s534_s7 }
  0x4e   : > { %p537_p5 = pnand %p536_p3, %p535_p0  ;;  %p543_p1 = scmp.lt.u32.totalorder %s534_s7, %s818_s4 }
  0x4f   : > { %p542_p9 = por %p541_p13, %p540_p10 }
  0x50   : > { %p538_p7 = pneg %p537_p5 }
  0x51   : > { %p544_p4 = por %p543_p1, %p542_p9 }
  0x53   : > { %p545_p2 = pnand %p544_p4, %p538_p7 }
  0x55   : > { %548 = shalt.err (!%p545_p2)
}
  0x56   : > { %s549_s18 = scalar_lea.vmem %s826_s5, 128  ;;  %s654_s27 = smov [#allocation2]  }
  0x57   : > { %p550_p6 = scmp.ne.s32.totalorder %s826_s5, %s549_s18  ;;  %s554_s30 = sshll.u32 %s654_s27, 4  ;;  %s555_s30 = int_to_ptr.vmem [resolvable:$false] %s554_s30 }
  0x58   : > { %s556_s21 = scalar_lea.vmem %s555_s30, 256  ;;  %p557_p5 = scmp.lt.s32.totalorder %s826_s5, %s555_s30 }
  0x59   : > { %p552_p12 = pnand %p550_p6, %p536_p3  ;;  %p558_p10 = scmp.lt.s32.totalorder %s556_s21, %s549_s18 }
  0x5b   : > { %p553_p0 = pneg %p552_p12  ;;  %p559_p13 = por %p558_p10, %p557_p5 }
  0x5d   : > { %p560_p9 = pnand %p559_p13, %p553_p0 }
  0x5f   : > { %563 = shalt.err (!%p560_p9)
}
  0x60   : > { %415 = dma.hbm_to_vmem [thread:$0]  (!%p822_p11), %s818_s4, 128, %s826_s5, %s185_s26  }
  0x61   : > { %p938_p7 = scmp.ne.s32.totalorder %s933_s24, 0 }
  0x62   : > { %s856_s7 = sand.u32 (!%p938_p7), 1, %s634_s13   ;;  %p939_p3 = scmp.ne.s32.totalorder (!%p938_p7), %s931_s22, 0 }
  0x63   : > { %205 = sbr.rel (%p938_p7) target bundleno = 249 (0xf9), region = 32  ;;  %s385_s8 = sshll.u32 (!%p938_p7), %s856_s7, 3 }
  0x64   : > { %s208_s10 = scalar_lea.sflag (!%p938_p7), [#allocation3], %s856_s7  ;;  %s211_s11 = scalar_lea.vmem (!%p938_p7), [#allocation2], %s385_s8 }
  0x6a   : > { %617 = dma.done.wait (%p939_p3), %s208_s10, 128  }
  0x6b   : > { %619 = vsyncadd (%p939_p3), %s208_s10, 4294967168  ;;  %p940_p1 = scmp.ne.s32.totalorder %s929_s20, 0 }
  0x6d   : > { %621 = dma.done.wait (%p940_p1), [#allocation6], 256  }
  0x6e   : > { %623 = vsyncadd (%p940_p1), [#allocation6], 4294967040  ;;  %v242_v0 = vld [vmem:[%s211_s11] sm:$0xff]  ;;  %s655_s24 = smov 127   ;;  %s656_s4 = smov 1   ;;  %v247_v1 = vlaneseq  ;;  %v252_v5 = vld [vmem:[#allocation5] sm:$0xff] }
  0x6f   : > { %243 = vrot.lane.b32.xlu0 %v242_v0, %s655_s24  ;;  %v253_v6 = vld [vmem:[#allocation7] sm:$0xff]  ;;  %v254_v7 = vmul.f32 %v252_v5, %v242_v0  ;;  %s390_s20 = sshll.u32 %s642_s15, 7  ;;  %s241_s22 = scalar_lea.vmem [#allocation8], %s385_s8 }
  0x70   : > { %v248_v2 = vand.u32 127, %v247_v1  ;;  %s273_s5 = sshll.u32 %s241_s22, 4  ;;  %s872_s28 = scalar_lea.hbm %s924_s3, %s390_s20  ;;  %s874_s5 = int_to_ptr.vmem [resolvable:$true] %s273_s5 }
  0x71   : > { %s259_s19 = scalar_lea.sflag [#allocation4], %s856_s7  ;;  %s564_s18 = scalar_lea.vmem %s874_s5, 128 }
  0x72   : > { %v249_v3 = vand.u32 1, %v248_v2  ;;  %p565_p11 = scmp.ne.s32.totalorder %s874_s5, %s564_s18  ;;  %s657_s15 = smov [#allocation8]  }
  0x73   : > { %245 = vrot.lane.b32.xlu0 %v242_v0, %s656_s4  ;;  %s568_s27 = sshll.u32 %s657_s15, 4  ;;  %s569_s27 = int_to_ptr.vmem [resolvable:$false] %s568_s27 }
  0x74   : > { %vm250_vm0 = vcmp.eq.s32.totalorder %v249_v3, 0  ;;  %p566_p4 = pnand %p565_p11, %p804_p8  ;;  %s570_s30 = scalar_lea.vmem %s569_s27, 256 }
  0x75   : > { %p571_p6 = scmp.lt.s32.totalorder %s874_s5, %s569_s27  ;;  %p572_p12 = scmp.lt.s32.totalorder %s570_s30, %s564_s18 }
  0x76   : > { %p567_p2 = pneg %p566_p4 }
  0x77   : > { %p573_p0 = por %p572_p12, %p571_p6 }
  0x79   : > { %p574_p5 = pnand %p573_p0, %p567_p2 }
  0xe1   : > { %v244_v4 = vpop.permute.xlu0 %243 }
  0xe5   : > { %v246_v8 = vpop.permute.xlu0 %245 }
  0xe6   : > { %v251_v9 = vsel %vm250_vm0, %v244_v4, %v246_v8 }
  0xe7   : > { %v255_v10 = vmul.f32 %v253_v6, %v251_v9 }
  0xe9   : > { %v256_v11 = vadd.f32 %v255_v10, %v254_v7 }
  0xeb   : > { %257 = vst [vmem:[%s241_s22] sm:$0xff] %v256_v11 }
  0xec   : > { %577 = shalt.err (!%p574_p5)
}
  0xed   : > { %s578_s21 = scalar_lea.hbm %s872_s28, 128  ;;  %s582_s10 = scalar_lea.hbm %s924_s3, 256 }
  0xee   : > { %p579_p10 = scmp.ne.s32.totalorder %s872_s28, %s578_s21  ;;  %p583_p7 = scmp.lt.u32.totalorder %s872_s28, %s924_s3 }
  0xef   : > { %p584_p3 = scmp.lt.u32.totalorder %s582_s10, %s578_s21  ;;  %p586_p11 = scmp.lt.u32.totalorder %s578_s21, %s872_s28 }
  0xf0   : > { %p580_p13 = pnand %p579_p10, %p804_p8 }
  0xf1   : > { %p585_p1 = por %p584_p3, %p583_p7 }
  0xf2   : > { %p581_p9 = pneg %p580_p13 }
  0xf3   : > { %p587_p4 = por %p586_p11, %p585_p1 }
  0xf5   : > { %p588_p2 = pnand %p587_p4, %p581_p9 }
  0xf7   : > { %591 = shalt.err (!%p588_p2)
}
  0xf8   : > { %403 = dma.vmem_to_hbm [thread:$0]  (%p804_p8), %s874_s5, 128, %s872_s28, %s259_s19  }
  0xf9 PF: > { %s285_s4 = sand.u32 1, %s630_s12   ;;  %p941_p6 = scmp.ne.s32.totalorder %s932_s23, 0 }
  0xfa   : > { %p942_p12 = scmp.ge.s32.totalorder %s650_s17, 2  ;;  %s286_s20 = scalar_lea.sflag [#allocation4], %s285_s4 }
  0xfc   : > { %p417_p0 = pnand %p942_p12, %p941_p6 }
  0xfe   : > { %625 = dma.done.wait (!%p417_p0), %s286_s20, 128  }
  0xff   : > { %627 = vsyncadd (!%p417_p0), %s286_s20, 4294967168  ;;  %s20_s17 = sadd.s32 1, %s650_s17   ;;  %s943_s12 = smov %s634_s13 }
 0x100   : > { %p17_p5 = scmp.ge.s32.totalorder %s20_s17, 4   ;;  %s944_s13 = smov %s638_s14 }
 0x101   : > { %s945_s14 = smov %s813_s25  ;;  %s946_s15 = smov %s646_s16 }
 0x102   : > { %s947_s16 = smov %s949_s9  ;;  %19 = sbr.rel (!%p17_p5) target bundleno = 7 (0x7), region = 87 }
 0x109   :  { %291 = vsyncpa [#allocation3], 1 }
 0x10a   :  { %293 = vsyncpa [#allocation3 + $0x1], 1 }
 0x10b   :  { %294 = vsyncpa [#allocation6], 1 }
 0x10c   :  { %295 = vsyncpa [#allocation4], 1 }
 0x10d   :  { %297 = vsyncpa [#allocation4 + $0x1], 1 }

</bundles_post_ra>
